<compile_context>
chip_gen: v7x
topology: tpu7x:2x2x1
jax: 0.10.0
libtpu: 0.0.40
codegen_flags: <defaults>
</compile_context>

<pallas_src>
import functools

import jax
import jax.numpy as jnp
from jax.experimental import pallas as pl
from jax.experimental.pallas import tpu as pltpu

_LN_EPS = 1e-5
_MIB = 1024 * 1024


def _encoder_kernel(x_ref, ln1g_ref, ln1b_ref,
                    wqkv_ref, bqkv_ref, wout_ref, bout_ref,
                    ln2g_ref, ln2b_ref,
                    wf1_ref, bf1_ref, wf2_ref, bf2_ref,
                    o_ref,
                    *, num_heads, head_dim, eps, compute_dtype, approx_recip):
    tb, pp, cc = x_ref.shape
    rows = tb * pp
    f32 = jnp.float32

    x = x_ref[...].reshape(rows, cc).astype(f32)

    # ---- LayerNorm 1 (f32 math) ----
    mu = jnp.mean(x, axis=-1, keepdims=True)
    xc = x - mu
    var = jnp.mean(xc * xc, axis=-1, keepdims=True)
    xn = xc * jax.lax.rsqrt(var + eps) * ln1g_ref[...] + ln1b_ref[...]

    # ---- fused QKV projection: one lane-dense (rows, C) @ (C, 3C) matmul.
    # The 1/sqrt(head_dim) scaling is pre-folded into the Q columns.
    qkv = jnp.dot(xn.astype(compute_dtype), wqkv_ref[...],
                  preferred_element_type=f32) + bqkv_ref[...]

    # ---- multi-head attention.
    # Per-head context is folded directly into the output projection
    # (ctx_h @ Wout[h*hd:(h+1)*hd, :]) so there is no per-head VMEM scratch
    # slab and no masked partial-lane stores.
    # TODO(synk): a single head-batched 4-D einsum would also remove the
    # per-head lane slices of qkv, but multi-batch-dim dot_general is not
    # reliably lowered by Mosaic, so a static per-head loop is kept.
    wout = wout_ref[...]
    mha = None
    for h in range(num_heads):
        lo = h * head_dim
        hi = lo + head_dim
        q_h = qkv[:, lo:hi].reshape(tb, pp, head_dim)            # already scaled
        k_h = qkv[:, cc + lo:cc + hi].reshape(tb, pp, head_dim)
        v_h = qkv[:, 2 * cc + lo:2 * cc + hi].reshape(tb, pp, head_dim)

        s = jnp.einsum('bqd,bkd->bqk',
                       q_h.astype(compute_dtype), k_h.astype(compute_dtype),
                       preferred_element_type=f32)
        s_max = jnp.max(s, axis=-1, keepdims=True)
        e = jnp.exp(s - s_max)
        denom = jnp.sum(e, axis=-1, keepdims=True)
        if approx_recip:
            attn = e * pl.reciprocal(denom, approx=True)     # EUP slot (bf16 path)
        else:
            attn = e / denom                                  # exact (f32 path)
        # TODO(synk): attn_dropout with p>0.0 not implemented (default 0.0 / eval).

        ctx_h = jnp.einsum('bqk,bkd->bqd',
                           attn.astype(compute_dtype), v_h.astype(compute_dtype),
                           preferred_element_type=f32)
        part = jnp.dot(ctx_h.reshape(rows, head_dim).astype(compute_dtype),
                       wout[lo:hi, :], preferred_element_type=f32)
        mha = part if mha is None else mha + part

    x1 = x + mha + bout_ref[...]          # residual 1 (dropout p=0 -> identity)

    # ---- LayerNorm 2 + FFN (Linear -> SiLU -> Linear) + residual 2 ----
    mu2 = jnp.mean(x1, axis=-1, keepdims=True)
    xc2 = x1 - mu2
    var2 = jnp.mean(xc2 * xc2, axis=-1, keepdims=True)
    xn2 = xc2 * jax.lax.rsqrt(var2 + eps) * ln2g_ref[...] + ln2b_ref[...]

    hid = jnp.dot(xn2.astype(compute_dtype), wf1_ref[...],
                  preferred_element_type=f32) + bf1_ref[...]
    hid = hid * jax.nn.sigmoid(hid)       # SiLU in f32
    ffn = jnp.dot(hid.astype(compute_dtype), wf2_ref[...],
                  preferred_element_type=f32) + bf2_ref[...]

    o_ref[...] = (x1 + ffn).reshape(tb, pp, cc).astype(o_ref.dtype)


def prepare_encoder_params(params, num_heads, *, compute_dtype=jnp.bfloat16):
    """One-time weight prep: transpose torch-Linear weights to x@W layout,
    fold the attention scaling into the Q columns, cast matmul operands to
    compute_dtype (bf16 default).  Call ONCE at init and reuse per forward."""
    f32 = jnp.float32
    embed = params['w_out'].shape[0]
    ffn_dim = params['w_ffn1'].shape[0]
    head_dim = embed // num_heads
    scaling = float(head_dim) ** -0.5
    col_scale = jnp.concatenate(
        [jnp.full((embed,), scaling, f32), jnp.ones((2 * embed,), f32)])
    return dict(
        wqkv=(params['w_qkv'].astype(f32).T * col_scale[None, :]).astype(compute_dtype),
        bqkv=(params['b_qkv'].astype(f32) * col_scale).reshape(1, 3 * embed),
        wout=params['w_out'].T.astype(compute_dtype),
        bout=params['b_out'].reshape(1, embed).astype(f32),
        wf1=params['w_ffn1'].T.astype(compute_dtype),
        bf1=params['b_ffn1'].reshape(1, ffn_dim).astype(f32),
        wf2=params['w_ffn2'].T.astype(compute_dtype),
        bf2=params['b_ffn2'].reshape(1, embed).astype(f32),
        g1=params['ln1_g'].reshape(1, embed).astype(f32),
        b1=params['ln1_b'].reshape(1, embed).astype(f32),
        g2=params['ln2_g'].reshape(1, embed).astype(f32),
        b2=params['ln2_b'].reshape(1, embed).astype(f32),
    )


def _pick_tile_b(batch, patches, target_rows=512):
    """Largest batch-tile (divisor of batch) giving ~target MXU rows per step,
    preferring an even grid length so v7x's 2 TensorCores both get work."""
    divisors = [d for d in range(1, batch + 1) if batch % d == 0]
    fitting = [d for d in divisors if d * patches <= max(target_rows, patches)]
    tb = max(fitting)
    if (batch // tb) % 2 != 0:
        even = [d for d in fitting if (batch // d) % 2 == 0]
        if even:
            tb_even = max(even)
            if tb_even * patches >= 128 or tb * patches < 128:
                tb = tb_even
    return tb


def _vmem_bytes_estimate(tile_b, patches, embed, ffn_dim, weight_bytes):
    """Rough VMEM footprint: weights (x2 pipeline buffers), double-buffered
    x/o tiles, and f32 intermediates."""
    rows = tile_b * patches
    weights = (3 * embed * embed + embed * embed + 2 * embed * ffn_dim) * weight_bytes
    biases = (8 * embed + 2 * ffn_dim) * 4
    act_io = 2 * 2 * rows * embed * 4
    inter = rows * (5 * embed + ffn_dim) * 4 + 2 * tile_b * patches * patches * 4
    return 2 * (weights + biases) + act_io + inter


def transformer_encoder(x, prep, num_heads, *, out_dtype=None, eps=_LN_EPS):
    """Pre-norm transformer encoder block (MobileViT).  x: (N, P, C).
    `prep` comes from prepare_encoder_params (hoisted one-time weight prep)."""
    batch, patches, embed = x.shape
    ffn_dim = prep['wf1'].shape[1]
    assert embed % num_heads == 0
    head_dim = embed // num_heads
    compute_dtype = prep['wqkv'].dtype
    approx_recip = bool(compute_dtype != jnp.float32)
    out_dtype = x.dtype if out_dtype is None else out_dtype

    # ---- VMEM budget (v7x: 64 MiB/TC, v5e/v6e: 128 MiB) and batch tiling ----
    try:
        phys_vmem = pltpu.get_tpu_info().vmem_capacity_bytes
    except Exception:
        phys_vmem = 64 * _MIB   # conservative fallback (v7x per-TC size)
    budget = max(int(phys_vmem * 0.75), 32 * _MIB)

    weight_bytes = compute_dtype.itemsize
    tile_b = _pick_tile_b(batch, patches)
    while tile_b > 1 and _vmem_bytes_estimate(
            tile_b, patches, embed, ffn_dim, weight_bytes) > budget:
        smaller = [d for d in range(1, tile_b) if batch % d == 0]
        tile_b = max(smaller) if smaller else 1
    est = _vmem_bytes_estimate(tile_b, patches, embed, ffn_dim, weight_bytes)
    vmem_limit = int(min(max(2 * est, 32 * _MIB), budget))

    kernel = functools.partial(
        _encoder_kernel, num_heads=num_heads, head_dim=head_dim,
        eps=eps, compute_dtype=compute_dtype, approx_recip=approx_recip)

    const = lambda b: (0, 0)  # constant block index -> weights stay VMEM-resident

    grid_spec = pltpu.PrefetchScalarGridSpec(
        num_scalar_prefetch=0,
        grid=(batch // tile_b,),
        in_specs=[
            pl.BlockSpec((tile_b, patches, embed), lambda b: (b, 0, 0)),  # x
            pl.BlockSpec((1, embed), const),            # ln1 gamma
            pl.BlockSpec((1, embed), const),            # ln1 beta
            pl.BlockSpec((embed, 3 * embed), const),    # fused qkv weight (Q scaled)
            pl.BlockSpec((1, 3 * embed), const),        # fused qkv bias (Q scaled)
            pl.BlockSpec((embed, embed), const),        # out-proj weight
            pl.BlockSpec((1, embed), const),            # out-proj bias
            pl.BlockSpec((1, embed), const),            # ln2 gamma
            pl.BlockSpec((1, embed), const),            # ln2 beta
            pl.BlockSpec((embed, ffn_dim), const),      # ffn1 weight
            pl.BlockSpec((1, ffn_dim), const),          # ffn1 bias
            pl.BlockSpec((ffn_dim, embed), const),      # ffn2 weight
            pl.BlockSpec((1, embed), const),            # ffn2 bias
        ],
        out_specs=pl.BlockSpec((tile_b, patches, embed), lambda b: (b, 0, 0)),
    )

    return pl.pallas_call(
        kernel,
        out_shape=jax.ShapeDtypeStruct((batch, patches, embed), out_dtype),
        grid_spec=grid_spec,
        compiler_params=pltpu.CompilerParams(
            dimension_semantics=("parallel",),
            vmem_limit_bytes=vmem_limit),
    )(x, prep['g1'], prep['b1'], prep['wqkv'], prep['bqkv'], prep['wout'],
      prep['bout'], prep['g2'], prep['b2'], prep['wf1'], prep['bf1'],
      prep['wf2'], prep['bf2'])


def transformer_encoder_ref(x, p, num_heads, eps=_LN_EPS):
    """Pure-JAX reference matching the PyTorch TransformerEncoder.forward."""
    def ln(v, g, b):
        mu = v.mean(-1, keepdims=True)
        var = ((v - mu) ** 2).mean(-1, keepdims=True)
        return (v - mu) / jnp.sqrt(var + eps) * g + b

    batch, patches, embed = x.shape
    hd = embed // num_heads
    scaling = float(hd) ** -0.5

    # pre_norm_mha: LayerNorm -> MHA -> Dropout(0)
    y = ln(x, p['ln1_g'], p['ln1_b'])
    qkv = y @ p['w_qkv'].T + p['b_qkv']
    qkv = qkv.reshape(batch, patches, 3, num_heads, hd)
    qkv = jnp.transpose(qkv, (0, 3, 2, 1, 4))
    q, k, v = qkv[:, :, 0], qkv[:, :, 1], qkv[:, :, 2]
    attn = jax.nn.softmax(jnp.einsum('bhpd,bhqd->bhpq', q * scaling, k), axis=-1)
    out = jnp.einsum('bhpq,bhqd->bhpd', attn, v)
    out = jnp.transpose(out, (0, 2, 1, 3)).reshape(batch, patches, embed)
    out = out @ p['w_out'].T + p['b_out']
    x = x + out

    # pre_norm_ffn: LayerNorm -> Linear -> SiLU -> Dropout(0) -> Linear -> Dropout(0)
    y = ln(x, p['ln2_g'], p['ln2_b'])
    h = y @ p['w_ffn1'].T + p['b_ffn1']
    h = h * jax.nn.sigmoid(h)
    y = h @ p['w_ffn2'].T + p['b_ffn2']
    return x + y


if __name__ == "__main__":
    # Small shapes consistent with the module's (N, P, C_in) convention.
    B, P, C, H, FFN_DIM = 2, 8, 32, 4, 64

    key = jax.random.PRNGKey(0)
    ks = jax.random.split(key, 13)

    x = jax.random.normal(ks[0], (B, P, C), dtype=jnp.float32)
    params = dict(
        ln1_g=1.0 + 0.1 * jax.random.normal(ks[1], (C,), jnp.float32),
        ln1_b=0.1 * jax.random.normal(ks[2], (C,), jnp.float32),
        w_qkv=0.05 * jax.random.normal(ks[3], (3 * C, C), jnp.float32),
        b_qkv=0.05 * jax.random.normal(ks[4], (3 * C,), jnp.float32),
        w_out=0.05 * jax.random.normal(ks[5], (C, C), jnp.float32),
        b_out=0.05 * jax.random.normal(ks[6], (C,), jnp.float32),
        ln2_g=1.0 + 0.1 * jax.random.normal(ks[7], (C,), jnp.float32),
        ln2_b=0.1 * jax.random.normal(ks[8], (C,), jnp.float32),
        w_ffn1=0.05 * jax.random.normal(ks[9], (FFN_DIM, C), jnp.float32),
        b_ffn1=0.05 * jax.random.normal(ks[10], (FFN_DIM,), jnp.float32),
        w_ffn2=0.05 * jax.random.normal(ks[11], (C, FFN_DIM), jnp.float32),
        b_ffn2=0.05 * jax.random.normal(ks[12], (C,), jnp.float32),
    )

    ref = transformer_encoder_ref(x, params, H)

    # f32 matmul-operand path (tight check against the PyTorch-style reference).
    prep_f32 = prepare_encoder_params(params, H, compute_dtype=jnp.float32)
    out_f32 = jax.block_until_ready(transformer_encoder(x, prep_f32, H))
    assert out_f32.shape == (B, P, C)
    assert jnp.allclose(out_f32, ref, atol=2e-3, rtol=2e-3), "f32 mismatch vs reference"

    # bf16 matmul-operand path (default; v5e/v6e/v7x MXU fast path), f32 accumulation.
    prep_bf16 = prepare_encoder_params(params, H)   # compute_dtype=bf16 default
    out_bf16 = jax.block_until_ready(transformer_encoder(x, prep_bf16, H))
    assert out_bf16.shape == (B, P, C)
    assert jnp.allclose(out_bf16, ref, atol=5e-2, rtol=5e-2), "bf16 mismatch vs reference"

    print("KERNEL_OK")
</pallas_src>

<mosaic_0001>
module attributes {stable_mosaic.version = 11 : i64} {
  func.func @_encoder_kernel(%arg0: i32, %arg1: memref<1x8x32xf32, #tpu.memory_space<vmem>>, %arg2: memref<1x32xf32, #tpu.memory_space<vmem>>, %arg3: memref<1x32xf32, #tpu.memory_space<vmem>>, %arg4: memref<32x96xf32, #tpu.memory_space<vmem>>, %arg5: memref<1x96xf32, #tpu.memory_space<vmem>>, %arg6: memref<32x32xf32, #tpu.memory_space<vmem>>, %arg7: memref<1x32xf32, #tpu.memory_space<vmem>>, %arg8: memref<1x32xf32, #tpu.memory_space<vmem>>, %arg9: memref<1x32xf32, #tpu.memory_space<vmem>>, %arg10: memref<32x64xf32, #tpu.memory_space<vmem>>, %arg11: memref<1x64xf32, #tpu.memory_space<vmem>>, %arg12: memref<64x32xf32, #tpu.memory_space<vmem>>, %arg13: memref<1x32xf32, #tpu.memory_space<vmem>>, %arg14: memref<1x8x32xf32, #tpu.memory_space<vmem>>) attributes {dimension_semantics = [#tpu.dimension_semantics<parallel>], iteration_bounds = array<i64: 2>, scalar_prefetch = 0 : i64, scratch_operands = 0 : i64, tpu.core_type = #tpu.core_type<tc>, window_params = [{transform_indices = @transform_0, window_bounds = array<i64: 1, 8, 32>}, {pipeline_mode = #tpu.pipeline_mode<synchronous>, transform_indices = @transform_1, window_bounds = array<i64: 1, 32>}, {pipeline_mode = #tpu.pipeline_mode<synchronous>, transform_indices = @transform_2, window_bounds = array<i64: 1, 32>}, {pipeline_mode = #tpu.pipeline_mode<synchronous>, transform_indices = @transform_3, window_bounds = array<i64: 32, 96>}, {pipeline_mode = #tpu.pipeline_mode<synchronous>, transform_indices = @transform_4, window_bounds = array<i64: 1, 96>}, {pipeline_mode = #tpu.pipeline_mode<synchronous>, transform_indices = @transform_5, window_bounds = array<i64: 32, 32>}, {pipeline_mode = #tpu.pipeline_mode<synchronous>, transform_indices = @transform_6, window_bounds = array<i64: 1, 32>}, {pipeline_mode = #tpu.pipeline_mode<synchronous>, transform_indices = @transform_7, window_bounds = array<i64: 1, 32>}, {pipeline_mode = #tpu.pipeline_mode<synchronous>, transform_indices = @transform_8, window_bounds = array<i64: 1, 32>}, {pipeline_mode = #tpu.pipeline_mode<synchronous>, transform_indices = @transform_9, window_bounds = array<i64: 32, 64>}, {pipeline_mode = #tpu.pipeline_mode<synchronous>, transform_indices = @transform_10, window_bounds = array<i64: 1, 64>}, {pipeline_mode = #tpu.pipeline_mode<synchronous>, transform_indices = @transform_11, window_bounds = array<i64: 64, 32>}, {pipeline_mode = #tpu.pipeline_mode<synchronous>, transform_indices = @transform_12, window_bounds = array<i64: 1, 32>}, {transform_indices = @transform_13, window_bounds = array<i64: 1, 8, 32>}]} {
    %c0 = arith.constant 0 : index
    %c0_0 = arith.constant 0 : index
    %c0_1 = arith.constant 0 : index
    %0 = vector.load %arg1[%c0, %c0_0, %c0_1] : memref<1x8x32xf32, #tpu.memory_space<vmem>>, vector<1x8x32xf32>
    %1 = vector.shape_cast %0 : vector<1x8x32xf32> to vector<8x32xf32>
    %cst = arith.constant dense<0.000000e+00> : vector<8xf32>
    %2 = vector.multi_reduction <add>, %1, %cst [1] : vector<8x32xf32> to vector<8xf32>
    %3 = vector.shape_cast %2 : vector<8xf32> to vector<8x1xf32>
    %cst_2 = arith.constant 3.200000e+01 : f32
    %4 = vector.broadcast %cst_2 : f32 to vector<8x1xf32>
    %5 = arith.divf %3, %4 : vector<8x1xf32>
    %6 = vector.broadcast %5 : vector<8x1xf32> to vector<8x32xf32>
    %7 = arith.subf %1, %6 : vector<8x32xf32>
    %8 = arith.mulf %7, %7 : vector<8x32xf32>
    %cst_3 = arith.constant dense<0.000000e+00> : vector<8xf32>
    %9 = vector.multi_reduction <add>, %8, %cst_3 [1] : vector<8x32xf32> to vector<8xf32>
    %10 = vector.shape_cast %9 : vector<8xf32> to vector<8x1xf32>
    %cst_4 = arith.constant 3.200000e+01 : f32
    %11 = vector.broadcast %cst_4 : f32 to vector<8x1xf32>
    %12 = arith.divf %10, %11 : vector<8x1xf32>
    %cst_5 = arith.constant 9.99999974E-6 : f32
    %13 = vector.broadcast %cst_5 : f32 to vector<8x1xf32>
    %14 = arith.addf %12, %13 : vector<8x1xf32>
    %15 = math.rsqrt %14 : vector<8x1xf32>
    %16 = vector.broadcast %15 : vector<8x1xf32> to vector<8x32xf32>
    %17 = arith.mulf %7, %16 : vector<8x32xf32>
    %c0_6 = arith.constant 0 : index
    %c0_7 = arith.constant 0 : index
    %18 = vector.load %arg2[%c0_6, %c0_7] : memref<1x32xf32, #tpu.memory_space<vmem>>, vector<1x32xf32>
    %19 = vector.broadcast %18 : vector<1x32xf32> to vector<8x32xf32>
    %20 = arith.mulf %17, %19 : vector<8x32xf32>
    %c0_8 = arith.constant 0 : index
    %c0_9 = arith.constant 0 : index
    %21 = vector.load %arg3[%c0_8, %c0_9] : memref<1x32xf32, #tpu.memory_space<vmem>>, vector<1x32xf32>
    %22 = vector.broadcast %21 : vector<1x32xf32> to vector<8x32xf32>
    %23 = arith.addf %20, %22 : vector<8x32xf32>
    %c0_10 = arith.constant 0 : index
    %c0_11 = arith.constant 0 : index
    %24 = vector.load %arg4[%c0_10, %c0_11] : memref<32x96xf32, #tpu.memory_space<vmem>>, vector<32x96xf32>
    %cst_12 = arith.constant dense<0.000000e+00> : vector<8x96xf32>
    %25 = tpu.matmul %23, %24, %cst_12 {dimension_numbers = #tpu.dot_dimension_numbers<[1], [0], [0], [1], [0, 0, 1, 1], [], []>} : vector<8x32xf32>, vector<32x96xf32>, vector<8x96xf32> -> vector<8x96xf32>
    %c0_13 = arith.constant 0 : index
    %c0_14 = arith.constant 0 : index
    %26 = vector.load %arg5[%c0_13, %c0_14] : memref<1x96xf32, #tpu.memory_space<vmem>>, vector<1x96xf32>
    %27 = vector.broadcast %26 : vector<1x96xf32> to vector<8x96xf32>
    %28 = arith.addf %25, %27 : vector<8x96xf32>
    %c0_15 = arith.constant 0 : index
    %c0_16 = arith.constant 0 : index
    %29 = vector.load %arg6[%c0_15, %c0_16] : memref<32x32xf32, #tpu.memory_space<vmem>>, vector<32x32xf32>
    %30 = vector.extract_strided_slice %28 {offsets = [0, 0], sizes = [8, 8], strides = [1, 1]} : vector<8x96xf32> to vector<8x8xf32>
    %31 = vector.shape_cast %30 : vector<8x8xf32> to vector<1x8x8xf32>
    %32 = vector.extract_strided_slice %28 {offsets = [0, 32], sizes = [8, 8], strides = [1, 1]} : vector<8x96xf32> to vector<8x8xf32>
    %33 = vector.shape_cast %32 : vector<8x8xf32> to vector<1x8x8xf32>
    %34 = vector.extract_strided_slice %28 {offsets = [0, 64], sizes = [8, 8], strides = [1, 1]} : vector<8x96xf32> to vector<8x8xf32>
    %35 = vector.shape_cast %34 : vector<8x8xf32> to vector<1x8x8xf32>
    "tpu.trace_start"() <{level = 10 : i32, message = "bqd,bkd->bqk"}> : () -> ()
    %cst_17 = arith.constant dense<0.000000e+00> : vector<1x8x8xf32>
    %36 = tpu.matmul %31, %33, %cst_17 {dimension_numbers = #tpu.dot_dimension_numbers<[2], [2], [1], [1], [0, 0, 0, 1, 1, 1], [0], [0]>} : vector<1x8x8xf32>, vector<1x8x8xf32>, vector<1x8x8xf32> -> vector<1x8x8xf32>
    "tpu.trace_stop"() : () -> ()
    %cst_18 = arith.constant dense<0xFF800000> : vector<1x8xf32>
    %37 = vector.multi_reduction <maximumf>, %36, %cst_18 [2] : vector<1x8x8xf32> to vector<1x8xf32>
    %38 = vector.shape_cast %37 : vector<1x8xf32> to vector<1x8x1xf32>
    %39 = vector.broadcast %38 : vector<1x8x1xf32> to vector<1x8x8xf32>
    %40 = arith.subf %36, %39 : vector<1x8x8xf32>
    %41 = math.exp %40 : vector<1x8x8xf32>
    %cst_19 = arith.constant dense<0.000000e+00> : vector<1x8xf32>
    %42 = vector.multi_reduction <add>, %41, %cst_19 [2] : vector<1x8x8xf32> to vector<1x8xf32>
    %43 = vector.shape_cast %42 : vector<1x8xf32> to vector<1x8x1xf32>
    %44 = vector.broadcast %43 : vector<1x8x1xf32> to vector<1x8x8xf32>
    %45 = arith.divf %41, %44 : vector<1x8x8xf32>
    "tpu.trace_start"() <{level = 10 : i32, message = "bqk,bkd->bqd"}> : () -> ()
    %cst_20 = arith.constant dense<0.000000e+00> : vector<1x8x8xf32>
    %46 = tpu.matmul %45, %35, %cst_20 {dimension_numbers = #tpu.dot_dimension_numbers<[2], [1], [1], [2], [0, 0, 0, 1, 1, 2], [0], [0]>} : vector<1x8x8xf32>, vector<1x8x8xf32>, vector<1x8x8xf32> -> vector<1x8x8xf32>
    "tpu.trace_stop"() : () -> ()
    %47 = vector.shape_cast %46 : vector<1x8x8xf32> to vector<8x8xf32>
    %48 = vector.extract_strided_slice %29 {offsets = [0, 0], sizes = [8, 32], strides = [1, 1]} : vector<32x32xf32> to vector<8x32xf32>
    %cst_21 = arith.constant dense<0.000000e+00> : vector<8x32xf32>
    %49 = tpu.matmul %47, %48, %cst_21 {dimension_numbers = #tpu.dot_dimension_numbers<[1], [0], [0], [1], [0, 0, 1, 1], [], []>} : vector<8x8xf32>, vector<8x32xf32>, vector<8x32xf32> -> vector<8x32xf32>
    %50 = vector.extract_strided_slice %28 {offsets = [0, 8], sizes = [8, 8], strides = [1, 1]} : vector<8x96xf32> to vector<8x8xf32>
    %51 = vector.shape_cast %50 : vector<8x8xf32> to vector<1x8x8xf32>
    %52 = vector.extract_strided_slice %28 {offsets = [0, 40], sizes = [8, 8], strides = [1, 1]} : vector<8x96xf32> to vector<8x8xf32>
    %53 = vector.shape_cast %52 : vector<8x8xf32> to vector<1x8x8xf32>
    %54 = vector.extract_strided_slice %28 {offsets = [0, 72], sizes = [8, 8], strides = [1, 1]} : vector<8x96xf32> to vector<8x8xf32>
    %55 = vector.shape_cast %54 : vector<8x8xf32> to vector<1x8x8xf32>
    "tpu.trace_start"() <{level = 10 : i32, message = "bqd,bkd->bqk"}> : () -> ()
    %cst_22 = arith.constant dense<0.000000e+00> : vector<1x8x8xf32>
    %56 = tpu.matmul %51, %53, %cst_22 {dimension_numbers = #tpu.dot_dimension_numbers<[2], [2], [1], [1], [0, 0, 0, 1, 1, 1], [0], [0]>} : vector<1x8x8xf32>, vector<1x8x8xf32>, vector<1x8x8xf32> -> vector<1x8x8xf32>
    "tpu.trace_stop"() : () -> ()
    %cst_23 = arith.constant dense<0xFF800000> : vector<1x8xf32>
    %57 = vector.multi_reduction <maximumf>, %56, %cst_23 [2] : vector<1x8x8xf32> to vector<1x8xf32>
    %58 = vector.shape_cast %57 : vector<1x8xf32> to vector<1x8x1xf32>
    %59 = vector.broadcast %58 : vector<1x8x1xf32> to vector<1x8x8xf32>
    %60 = arith.subf %56, %59 : vector<1x8x8xf32>
    %61 = math.exp %60 : vector<1x8x8xf32>
    %cst_24 = arith.constant dense<0.000000e+00> : vector<1x8xf32>
    %62 = vector.multi_reduction <add>, %61, %cst_24 [2] : vector<1x8x8xf32> to vector<1x8xf32>
    %63 = vector.shape_cast %62 : vector<1x8xf32> to vector<1x8x1xf32>
    %64 = vector.broadcast %63 : vector<1x8x1xf32> to vector<1x8x8xf32>
    %65 = arith.divf %61, %64 : vector<1x8x8xf32>
    "tpu.trace_start"() <{level = 10 : i32, message = "bqk,bkd->bqd"}> : () -> ()
    %cst_25 = arith.constant dense<0.000000e+00> : vector<1x8x8xf32>
    %66 = tpu.matmul %65, %55, %cst_25 {dimension_numbers = #tpu.dot_dimension_numbers<[2], [1], [1], [2], [0, 0, 0, 1, 1, 2], [0], [0]>} : vector<1x8x8xf32>, vector<1x8x8xf32>, vector<1x8x8xf32> -> vector<1x8x8xf32>
    "tpu.trace_stop"() : () -> ()
    %67 = vector.shape_cast %66 : vector<1x8x8xf32> to vector<8x8xf32>
    %68 = vector.extract_strided_slice %29 {offsets = [8, 0], sizes = [8, 32], strides = [1, 1]} : vector<32x32xf32> to vector<8x32xf32>
    %cst_26 = arith.constant dense<0.000000e+00> : vector<8x32xf32>
    %69 = tpu.matmul %67, %68, %cst_26 {dimension_numbers = #tpu.dot_dimension_numbers<[1], [0], [0], [1], [0, 0, 1, 1], [], []>} : vector<8x8xf32>, vector<8x32xf32>, vector<8x32xf32> -> vector<8x32xf32>
    %70 = arith.addf %49, %69 : vector<8x32xf32>
    %71 = vector.extract_strided_slice %28 {offsets = [0, 16], sizes = [8, 8], strides = [1, 1]} : vector<8x96xf32> to vector<8x8xf32>
    %72 = vector.shape_cast %71 : vector<8x8xf32> to vector<1x8x8xf32>
    %73 = vector.extract_strided_slice %28 {offsets = [0, 48], sizes = [8, 8], strides = [1, 1]} : vector<8x96xf32> to vector<8x8xf32>
    %74 = vector.shape_cast %73 : vector<8x8xf32> to vector<1x8x8xf32>
    %75 = vector.extract_strided_slice %28 {offsets = [0, 80], sizes = [8, 8], strides = [1, 1]} : vector<8x96xf32> to vector<8x8xf32>
    %76 = vector.shape_cast %75 : vector<8x8xf32> to vector<1x8x8xf32>
    "tpu.trace_start"() <{level = 10 : i32, message = "bqd,bkd->bqk"}> : () -> ()
    %cst_27 = arith.constant dense<0.000000e+00> : vector<1x8x8xf32>
    %77 = tpu.matmul %72, %74, %cst_27 {dimension_numbers = #tpu.dot_dimension_numbers<[2], [2], [1], [1], [0, 0, 0, 1, 1, 1], [0], [0]>} : vector<1x8x8xf32>, vector<1x8x8xf32>, vector<1x8x8xf32> -> vector<1x8x8xf32>
    "tpu.trace_stop"() : () -> ()
    %cst_28 = arith.constant dense<0xFF800000> : vector<1x8xf32>
    %78 = vector.multi_reduction <maximumf>, %77, %cst_28 [2] : vector<1x8x8xf32> to vector<1x8xf32>
    %79 = vector.shape_cast %78 : vector<1x8xf32> to vector<1x8x1xf32>
    %80 = vector.broadcast %79 : vector<1x8x1xf32> to vector<1x8x8xf32>
    %81 = arith.subf %77, %80 : vector<1x8x8xf32>
    %82 = math.exp %81 : vector<1x8x8xf32>
    %cst_29 = arith.constant dense<0.000000e+00> : vector<1x8xf32>
    %83 = vector.multi_reduction <add>, %82, %cst_29 [2] : vector<1x8x8xf32> to vector<1x8xf32>
    %84 = vector.shape_cast %83 : vector<1x8xf32> to vector<1x8x1xf32>
    %85 = vector.broadcast %84 : vector<1x8x1xf32> to vector<1x8x8xf32>
    %86 = arith.divf %82, %85 : vector<1x8x8xf32>
    "tpu.trace_start"() <{level = 10 : i32, message = "bqk,bkd->bqd"}> : () -> ()
    %cst_30 = arith.constant dense<0.000000e+00> : vector<1x8x8xf32>
    %87 = tpu.matmul %86, %76, %cst_30 {dimension_numbers = #tpu.dot_dimension_numbers<[2], [1], [1], [2], [0, 0, 0, 1, 1, 2], [0], [0]>} : vector<1x8x8xf32>, vector<1x8x8xf32>, vector<1x8x8xf32> -> vector<1x8x8xf32>
    "tpu.trace_stop"() : () -> ()
    %88 = vector.shape_cast %87 : vector<1x8x8xf32> to vector<8x8xf32>
    %89 = vector.extract_strided_slice %29 {offsets = [16, 0], sizes = [8, 32], strides = [1, 1]} : vector<32x32xf32> to vector<8x32xf32>
    %cst_31 = arith.constant dense<0.000000e+00> : vector<8x32xf32>
    %90 = tpu.matmul %88, %89, %cst_31 {dimension_numbers = #tpu.dot_dimension_numbers<[1], [0], [0], [1], [0, 0, 1, 1], [], []>} : vector<8x8xf32>, vector<8x32xf32>, vector<8x32xf32> -> vector<8x32xf32>
    %91 = arith.addf %70, %90 : vector<8x32xf32>
    %92 = vector.extract_strided_slice %28 {offsets = [0, 24], sizes = [8, 8], strides = [1, 1]} : vector<8x96xf32> to vector<8x8xf32>
    %93 = vector.shape_cast %92 : vector<8x8xf32> to vector<1x8x8xf32>
    %94 = vector.extract_strided_slice %28 {offsets = [0, 56], sizes = [8, 8], strides = [1, 1]} : vector<8x96xf32> to vector<8x8xf32>
    %95 = vector.shape_cast %94 : vector<8x8xf32> to vector<1x8x8xf32>
    %96 = vector.extract_strided_slice %28 {offsets = [0, 88], sizes = [8, 8], strides = [1, 1]} : vector<8x96xf32> to vector<8x8xf32>
    %97 = vector.shape_cast %96 : vector<8x8xf32> to vector<1x8x8xf32>
    "tpu.trace_start"() <{level = 10 : i32, message = "bqd,bkd->bqk"}> : () -> ()
    %cst_32 = arith.constant dense<0.000000e+00> : vector<1x8x8xf32>
    %98 = tpu.matmul %93, %95, %cst_32 {dimension_numbers = #tpu.dot_dimension_numbers<[2], [2], [1], [1], [0, 0, 0, 1, 1, 1], [0], [0]>} : vector<1x8x8xf32>, vector<1x8x8xf32>, vector<1x8x8xf32> -> vector<1x8x8xf32>
    "tpu.trace_stop"() : () -> ()
    %cst_33 = arith.constant dense<0xFF800000> : vector<1x8xf32>
    %99 = vector.multi_reduction <maximumf>, %98, %cst_33 [2] : vector<1x8x8xf32> to vector<1x8xf32>
    %100 = vector.shape_cast %99 : vector<1x8xf32> to vector<1x8x1xf32>
    %101 = vector.broadcast %100 : vector<1x8x1xf32> to vector<1x8x8xf32>
    %102 = arith.subf %98, %101 : vector<1x8x8xf32>
    %103 = math.exp %102 : vector<1x8x8xf32>
    %cst_34 = arith.constant dense<0.000000e+00> : vector<1x8xf32>
    %104 = vector.multi_reduction <add>, %103, %cst_34 [2] : vector<1x8x8xf32> to vector<1x8xf32>
    %105 = vector.shape_cast %104 : vector<1x8xf32> to vector<1x8x1xf32>
    %106 = vector.broadcast %105 : vector<1x8x1xf32> to vector<1x8x8xf32>
    %107 = arith.divf %103, %106 : vector<1x8x8xf32>
    "tpu.trace_start"() <{level = 10 : i32, message = "bqk,bkd->bqd"}> : () -> ()
    %cst_35 = arith.constant dense<0.000000e+00> : vector<1x8x8xf32>
    %108 = tpu.matmul %107, %97, %cst_35 {dimension_numbers = #tpu.dot_dimension_numbers<[2], [1], [1], [2], [0, 0, 0, 1, 1, 2], [0], [0]>} : vector<1x8x8xf32>, vector<1x8x8xf32>, vector<1x8x8xf32> -> vector<1x8x8xf32>
    "tpu.trace_stop"() : () -> ()
    %109 = vector.shape_cast %108 : vector<1x8x8xf32> to vector<8x8xf32>
    %110 = vector.extract_strided_slice %29 {offsets = [24, 0], sizes = [8, 32], strides = [1, 1]} : vector<32x32xf32> to vector<8x32xf32>
    %cst_36 = arith.constant dense<0.000000e+00> : vector<8x32xf32>
    %111 = tpu.matmul %109, %110, %cst_36 {dimension_numbers = #tpu.dot_dimension_numbers<[1], [0], [0], [1], [0, 0, 1, 1], [], []>} : vector<8x8xf32>, vector<8x32xf32>, vector<8x32xf32> -> vector<8x32xf32>
    %112 = arith.addf %91, %111 : vector<8x32xf32>
    %113 = arith.addf %1, %112 : vector<8x32xf32>
    %c0_37 = arith.constant 0 : index
    %c0_38 = arith.constant 0 : index
    %114 = vector.load %arg7[%c0_37, %c0_38] : memref<1x32xf32, #tpu.memory_space<vmem>>, vector<1x32xf32>
    %115 = vector.broadcast %114 : vector<1x32xf32> to vector<8x32xf32>
    %116 = arith.addf %113, %115 : vector<8x32xf32>
    %cst_39 = arith.constant dense<0.000000e+00> : vector<8xf32>
    %117 = vector.multi_reduction <add>, %116, %cst_39 [1] : vector<8x32xf32> to vector<8xf32>
    %118 = vector.shape_cast %117 : vector<8xf32> to vector<8x1xf32>
    %cst_40 = arith.constant 3.200000e+01 : f32
    %119 = vector.broadcast %cst_40 : f32 to vector<8x1xf32>
    %120 = arith.divf %118, %119 : vector<8x1xf32>
    %121 = vector.broadcast %120 : vector<8x1xf32> to vector<8x32xf32>
    %122 = arith.subf %116, %121 : vector<8x32xf32>
    %123 = arith.mulf %122, %122 : vector<8x32xf32>
    %cst_41 = arith.constant dense<0.000000e+00> : vector<8xf32>
    %124 = vector.multi_reduction <add>, %123, %cst_41 [1] : vector<8x32xf32> to vector<8xf32>
    %125 = vector.shape_cast %124 : vector<8xf32> to vector<8x1xf32>
    %cst_42 = arith.constant 3.200000e+01 : f32
    %126 = vector.broadcast %cst_42 : f32 to vector<8x1xf32>
    %127 = arith.divf %125, %126 : vector<8x1xf32>
    %cst_43 = arith.constant 9.99999974E-6 : f32
    %128 = vector.broadcast %cst_43 : f32 to vector<8x1xf32>
    %129 = arith.addf %127, %128 : vector<8x1xf32>
    %130 = math.rsqrt %129 : vector<8x1xf32>
    %131 = vector.broadcast %130 : vector<8x1xf32> to vector<8x32xf32>
    %132 = arith.mulf %122, %131 : vector<8x32xf32>
    %c0_44 = arith.constant 0 : index
    %c0_45 = arith.constant 0 : index
    %133 = vector.load %arg8[%c0_44, %c0_45] : memref<1x32xf32, #tpu.memory_space<vmem>>, vector<1x32xf32>
    %134 = vector.broadcast %133 : vector<1x32xf32> to vector<8x32xf32>
    %135 = arith.mulf %132, %134 : vector<8x32xf32>
    %c0_46 = arith.constant 0 : index
    %c0_47 = arith.constant 0 : index
    %136 = vector.load %arg9[%c0_46, %c0_47] : memref<1x32xf32, #tpu.memory_space<vmem>>, vector<1x32xf32>
    %137 = vector.broadcast %136 : vector<1x32xf32> to vector<8x32xf32>
    %138 = arith.addf %135, %137 : vector<8x32xf32>
    %c0_48 = arith.constant 0 : index
    %c0_49 = arith.constant 0 : index
    %139 = vector.load %arg10[%c0_48, %c0_49] : memref<32x64xf32, #tpu.memory_space<vmem>>, vector<32x64xf32>
    %cst_50 = arith.constant dense<0.000000e+00> : vector<8x64xf32>
    %140 = tpu.matmul %138, %139, %cst_50 {dimension_numbers = #tpu.dot_dimension_numbers<[1], [0], [0], [1], [0, 0, 1, 1], [], []>} : vector<8x32xf32>, vector<32x64xf32>, vector<8x64xf32> -> vector<8x64xf32>
    %c0_51 = arith.constant 0 : index
    %c0_52 = arith.constant 0 : index
    %141 = vector.load %arg11[%c0_51, %c0_52] : memref<1x64xf32, #tpu.memory_space<vmem>>, vector<1x64xf32>
    %142 = vector.broadcast %141 : vector<1x64xf32> to vector<8x64xf32>
    %143 = arith.addf %140, %142 : vector<8x64xf32>
    %144 = arith.negf %143 : vector<8x64xf32>
    %145 = math.exp %144 : vector<8x64xf32>
    %cst_53 = arith.constant 1.000000e+00 : f32
    %146 = vector.broadcast %cst_53 : f32 to vector<8x64xf32>
    %147 = arith.addf %146, %145 : vector<8x64xf32>
    %148 = arith.divf %146, %147 : vector<8x64xf32>
    %149 = arith.mulf %143, %148 : vector<8x64xf32>
    %c0_54 = arith.constant 0 : index
    %c0_55 = arith.constant 0 : index
    %150 = vector.load %arg12[%c0_54, %c0_55] : memref<64x32xf32, #tpu.memory_space<vmem>>, vector<64x32xf32>
    %cst_56 = arith.constant dense<0.000000e+00> : vector<8x32xf32>
    %151 = tpu.matmul %149, %150, %cst_56 {dimension_numbers = #tpu.dot_dimension_numbers<[1], [0], [0], [1], [0, 0, 1, 1], [], []>} : vector<8x64xf32>, vector<64x32xf32>, vector<8x32xf32> -> vector<8x32xf32>
    %c0_57 = arith.constant 0 : index
    %c0_58 = arith.constant 0 : index
    %152 = vector.load %arg13[%c0_57, %c0_58] : memref<1x32xf32, #tpu.memory_space<vmem>>, vector<1x32xf32>
    %153 = vector.broadcast %152 : vector<1x32xf32> to vector<8x32xf32>
    %154 = arith.addf %151, %153 : vector<8x32xf32>
    %155 = arith.addf %116, %154 : vector<8x32xf32>
    %156 = vector.shape_cast %155 : vector<8x32xf32> to vector<1x8x32xf32>
    %c0_59 = arith.constant 0 : index
    %c0_60 = arith.constant 0 : index
    %c0_61 = arith.constant 0 : index
    %157 = vector.load %arg14[%c0_59, %c0_60, %c0_61] : memref<1x8x32xf32, #tpu.memory_space<vmem>>, vector<1x8x32xf32>
    tpu.vector_store %arg14[%c0_59, %c0_60, %c0_61], %156 {strides = array<i32>} : memref<1x8x32xf32, #tpu.memory_space<vmem>>, vector<1x8x32xf32>,
    return
  }
  func.func @transform_0(%arg0: i32) -> (i32, i32, i32) {
    %c0_i32 = arith.constant 0 : i32
    %c0_i32_0 = arith.constant 0 : i32
    %c0_i32_1 = arith.constant 0 : i32
    return %arg0, %c0_i32, %c0_i32_0 : i32, i32, i32
  }
  func.func @transform_1(%arg0: i32) -> (i32, i32) {
    %c0_i32 = arith.constant 0 : i32
    %c0_i32_0 = arith.constant 0 : i32
    %c0_i32_1 = arith.constant 0 : i32
    return %c0_i32, %c0_i32_0 : i32, i32
  }
  func.func @transform_2(%arg0: i32) -> (i32, i32) {
    %c0_i32 = arith.constant 0 : i32
    %c0_i32_0 = arith.constant 0 : i32
    %c0_i32_1 = arith.constant 0 : i32
    return %c0_i32, %c0_i32_0 : i32, i32
  }
  func.func @transform_3(%arg0: i32) -> (i32, i32) {
    %c0_i32 = arith.constant 0 : i32
    %c0_i32_0 = arith.constant 0 : i32
    %c0_i32_1 = arith.constant 0 : i32
    return %c0_i32, %c0_i32_0 : i32, i32
  }
  func.func @transform_4(%arg0: i32) -> (i32, i32) {
    %c0_i32 = arith.constant 0 : i32
    %c0_i32_0 = arith.constant 0 : i32
    %c0_i32_1 = arith.constant 0 : i32
    return %c0_i32, %c0_i32_0 : i32, i32
  }
  func.func @transform_5(%arg0: i32) -> (i32, i32) {
    %c0_i32 = arith.constant 0 : i32
    %c0_i32_0 = arith.constant 0 : i32
    %c0_i32_1 = arith.constant 0 : i32
    return %c0_i32, %c0_i32_0 : i32, i32
  }
  func.func @transform_6(%arg0: i32) -> (i32, i32) {
    %c0_i32 = arith.constant 0 : i32
    %c0_i32_0 = arith.constant 0 : i32
    %c0_i32_1 = arith.constant 0 : i32
    return %c0_i32, %c0_i32_0 : i32, i32
  }
  func.func @transform_7(%arg0: i32) -> (i32, i32) {
    %c0_i32 = arith.constant 0 : i32
    %c0_i32_0 = arith.constant 0 : i32
    %c0_i32_1 = arith.constant 0 : i32
    return %c0_i32, %c0_i32_0 : i32, i32
  }
  func.func @transform_8(%arg0: i32) -> (i32, i32) {
    %c0_i32 = arith.constant 0 : i32
    %c0_i32_0 = arith.constant 0 : i32
    %c0_i32_1 = arith.constant 0 : i32
    return %c0_i32, %c0_i32_0 : i32, i32
  }
  func.func @transform_9(%arg0: i32) -> (i32, i32) {
    %c0_i32 = arith.constant 0 : i32
    %c0_i32_0 = arith.constant 0 : i32
    %c0_i32_1 = arith.constant 0 : i32
    return %c0_i32, %c0_i32_0 : i32, i32
  }
  func.func @transform_10(%arg0: i32) -> (i32, i32) {
    %c0_i32 = arith.constant 0 : i32
    %c0_i32_0 = arith.constant 0 : i32
    %c0_i32_1 = arith.constant 0 : i32
    return %c0_i32, %c0_i32_0 : i32, i32
  }
  func.func @transform_11(%arg0: i32) -> (i32, i32) {
    %c0_i32 = arith.constant 0 : i32
    %c0_i32_0 = arith.constant 0 : i32
    %c0_i32_1 = arith.constant 0 : i32
    return %c0_i32, %c0_i32_0 : i32, i32
  }
  func.func @transform_12(%arg0: i32) -> (i32, i32) {
    %c0_i32 = arith.constant 0 : i32
    %c0_i32_0 = arith.constant 0 : i32
    %c0_i32_1 = arith.constant 0 : i32
    return %c0_i32, %c0_i32_0 : i32, i32
  }
  func.func @transform_13(%arg0: i32) -> (i32, i32, i32) {
    %c0_i32 = arith.constant 0 : i32
    %c0_i32_0 = arith.constant 0 : i32
    %c0_i32_1 = arith.constant 0 : i32
    return %arg0, %c0_i32, %c0_i32_0 : i32, i32, i32
  }
}

</mosaic_0001>

<bundles_post_ra>
// kernel: tpu_custom_call.1
= control target key start
LH: loop header
LB: loop body
LE: loop exit
PB: predicated region body
PF: predicated region fallthrough
CT: control target
= control target key end

     0   :  { %18 = vsyncpa [#allocation3], 0  ;;  %s2664_s0 = inlined_call_operand.hbm [shape: f32[2,8,32], index: 0, kind: input, shape index: {}]   ;;  %s2665_s1 = inlined_call_operand.vmem [shape: f32[1,32], index: 1, kind: input, shape index: {}]   ;;  %s2666_s2 = inlined_call_operand.vmem [shape: f32[1,32], index: 2, kind: input, shape index: {}]   ;;  %s2667_s3 = inlined_call_operand.vmem [shape: f32[32,96], index: 3, kind: input, shape index: {}]   ;;  %s2668_s4 = inlined_call_operand.vmem [shape: f32[1,96], index: 4, kind: input, shape index: {}]   ;;  %s2669_s5 = inlined_call_operand.vmem [shape: f32[32,32], index: 5, kind: input, shape index: {}]   ;;  %s2670_s6 = inlined_call_operand.vmem [shape: f32[1,32], index: 6, kind: input, shape index: {}]   ;;  %s2671_s7 = inlined_call_operand.vmem [shape: f32[1,32], index: 7, kind: input, shape index: {}]   ;;  %s2672_s8 = inlined_call_operand.vmem [shape: f32[1,32], index: 8, kind: input, shape index: {}]   ;;  %s2673_s9 = inlined_call_operand.vmem [shape: f32[32,64], index: 9, kind: input, shape index: {}]   ;;  %s2674_s10 = inlined_call_operand.vmem [shape: f32[1,64], index: 10, kind: input, shape index: {}]   ;;  %s2675_s11 = inlined_call_operand.vmem [shape: f32[64,32], index: 11, kind: input, shape index: {}]   ;;  %s2676_s12 = inlined_call_operand.vmem [shape: f32[1,32], index: 12, kind: input, shape index: {}]   ;;  %s2677_s13 = inlined_call_operand.hbm [shape: f32[2,8,32], index: 13, kind: output, shape index: {}]  }
   0x1   :  { %20 = vsyncpa [#allocation3 + $0x1], 0 }
   0x2   :  { %21 = vsyncpa [#allocation4], 0 }
   0x3   :  { %23 = vsyncpa [#allocation4 + $0x1], 0  ;;  %s2310_s25 = smov 0   ;;  %s2312_s26 = smov 0  }
   0x4   :  { %s2314_s27 = smov 0   ;;  %s2316_s28 = smov 0  }
   0x5 LB: > { %2683 = sst [smem:[#allocation8_spill]] %s2210_s25  ;;  %s2331_s29 = sadd.s32 4294967295, %s2222_s28   ;;  %s2222_s28 = sphi %s2316_s28, %s2698_s28   ;;  %s2218_s27 = sphi %s2314_s27, %s2700_s27   ;;  %s2214_s26 = sphi %s2312_s26, %s2702_s26   ;;  %s2210_s25 = sphi %s2310_s25, %s2701_s25  }
   0x6   : > { %2684 = sst [smem:[#allocation9_spill]] %s2218_s27  ;;  %s1834_s30 = sadd.s32 4294967294, %s2222_s28  }
   0x7   : > { %s2335_s14 = sadd.s32 1, %s2222_s28   ;;  %s36_s15 = sadd.s32 1, %s2218_s27 }
   0x8   : > { %2685 = sst [smem:[#allocation10_spill]] %s2335_s14  ;;  %s33_s16 = ssub.s32 %s2222_s28, %s2335_s14 }
   0x9   : > { %p43_p0 = scmp.ne.s32.totalorder %s2218_s27, %s2214_s26  ;;  %p34_p1 = scmp.eq.s32.totalorder %s33_s16, 0 }
   0xa   : > { %p44_p2 = scmp.eq.s32.totalorder %s2222_s28, 0  ;;  %p49_p3 = scmp.ne.s32.totalorder %s2214_s26, %s2210_s25 }
   0xb   : > { %p50_p4 = scmp.eq.s32.totalorder %s2331_s29, 0  ;;  %p325_p7 = scmp.eq.s32.totalorder %s2331_s29, 1 }
   0xc   : > { %s2347_s17 = scalar_select %p34_p1, %s2218_s27, %s36_s15  }
   0xd   : > { %p2349_p5 = por %p44_p2, %p43_p0  ;;  %p2353_p6 = por %p50_p4, %p49_p3 }
   0xe   : > { %2686 = sst [smem:[#allocation11_spill]] %s2347_s17  ;;  %p331_p8 = scmp.eq.s32.totalorder %s1834_s30, 1 }
   0xf   : > { %p2054_p10 = scmp.lt.s32.totalorder %s2222_s28, 2  ;;  %p2360_p11 = por %p325_p7, %p43_p0 }
  0x10   : > { %p2364_p12 = por %p331_p8, %p49_p3  ;;  %s387_s22 = sand.u32 1, %s2218_s27  }
  0x11   : > { %s2689_s20 = scalar_select %p2360_p11, 1, 0 }
  0x12   : > { %s2690_s21 = scalar_select %p2364_p12, 1, 0 }
  0x13   : > { %s1838_s23 = sshll.u32 %s2222_s28, 7  ;;  %s1837_s24 = sshll.u32 %s387_s22, 3 }
  0x14   : > { %s2373_s17 = scalar_lea.hbm %s2664_s0, %s1838_s23  ;;  %s391_s30 = scalar_lea.vmem [#allocation2], %s1837_s24 }
  0x15   : > { %s398_s14 = sshll.u32 %s391_s30, 4  ;;  %p2377_p13 = pnand %p2054_p10, %p2349_p5  ;;  %s2381_s14 = int_to_ptr.vmem [resolvable:$true] %s398_s14 }
  0x16   : > { %s388_s15 = scalar_lea.sflag [#allocation3], %s387_s22  ;;  %s2126_s23 = scalar_lea.hbm %s2373_s17, 128 }
  0x17   : > { %p2127_p2 = scmp.ne.s32.totalorder %s2373_s17, %s2126_s23  ;;  %p2128_p3 = pneg %p2377_p13 }
  0x18   : > { %s2131_s16 = scalar_lea.hbm %s2664_s0, 256  ;;  %p2132_p5 = scmp.lt.u32.totalorder %s2373_s17, %s2664_s0 }
  0x19   : > { %p2129_p4 = pnand %p2128_p3, %p2127_p2  ;;  %p2133_p8 = scmp.lt.u32.totalorder %s2131_s16, %s2126_s23 }
  0x1a   : > { %p2135_p9 = scmp.lt.u32.totalorder %s2126_s23, %s2373_s17 }
  0x1b   : > { %p2130_p7 = pneg %p2129_p4  ;;  %p2134_p10 = por %p2133_p8, %p2132_p5 }
  0x1d   : > { %p2136_p0 = por %p2135_p9, %p2134_p10 }
  0x1f   : > { %p2137_p1 = pnand %p2136_p0, %p2130_p7 }
  0x21   : > { %2140 = shalt.err (!%p2137_p1)
}
  0x22   : > { %s2141_s22 = scalar_lea.vmem %s2381_s14, 128  ;;  %s2224_s18 = smov [#allocation2]  }
  0x23   : > { %p2142_p2 = scmp.ne.s32.totalorder %s2381_s14, %s2141_s22  ;;  %s2146_s24 = sshll.u32 %s2224_s18, 4  ;;  %s2147_s24 = int_to_ptr.vmem [resolvable:$false] %s2146_s24 }
  0x24   : > { %s2148_s27 = scalar_lea.vmem %s2147_s24, 256  ;;  %p2149_p11 = scmp.lt.s32.totalorder %s2381_s14, %s2147_s24 }
  0x25   : > { %p2144_p4 = pnand %p2142_p2, %p2128_p3  ;;  %p2150_p5 = scmp.lt.s32.totalorder %s2148_s27, %s2141_s22 }
  0x27   : > { %p2145_p12 = pneg %p2144_p4  ;;  %p2151_p8 = por %p2150_p5, %p2149_p11 }
  0x29   : > { %p2152_p9 = pnand %p2151_p8, %p2145_p12 }
  0x2b   : > { %2155 = shalt.err (!%p2152_p9)
}
  0x2c   : > { %2049 = dma.hbm_to_vmem [thread:$0]  (!%p2377_p13), %s2373_s17, 128, %s2381_s14, %s388_s15  }
  0x2d   : > { %p2692_p0 = scmp.lt.s32.totalorder %s2222_s28, 3  ;;  %p2693_p1 = scmp.ge.s32.totalorder %s2222_s28, 1 }
  0x2f   : > { %p404_p3 = pnand %p2693_p1, %p2692_p0 }
  0x30   : > { %s2415_s23 = sand.u32 (!%p404_p3), 1, %s2214_s26  }
  0x31   : > { %407 = sbr.rel (%p404_p3) target bundleno = 3720 (0xe88), region = 72  ;;  %s1840_s16 = sshll.u32 (!%p404_p3), %s2415_s23, 3 }
  0x32   : > { %s410_s30 = scalar_lea.sflag (!%p404_p3), [#allocation3], %s2415_s23  ;;  %s413_s25 = scalar_lea.vmem (!%p404_p3), [#allocation2], %s1840_s16 }
  0x38   : > { %2201 = dma.done.wait (%p2353_p6), %s410_s30, 128  }
  0x39   : > { %2203 = vsyncadd (%p2353_p6), %s410_s30, 4294967168  ;;  %vm457_vm0 = vcmask 261120   ;;  %v2425_v0 = vld [vmem:[%s413_s25] sm:$0xff]  ;;  %v490_v9 = vld [vmem:[%s2667_s3 + $0x10] sm:$0xff]  ;;  %v2225_v10 = vmov 0.0|0.0   ;;  %vm2226_vm1 = vmmov 0  }
  0x3a   : > { %v458_v1 = vsel %vm457_vm0, %v2425_v0, 0.0  ;;  %v488_v7 = vld [vmem:[%s2667_s3] sm:$0xff]  ;;  %v489_v8 = vld [vmem:[%s2667_s3 + $0x8] sm:$0xff]  ;;  %2018 = vmatprep.subr.bf16.mxu0 %v2225_v10  ;;  %v491_v12 = vld [vmem:[%s2667_s3 + $0x18] sm:$0xff]  ;;  %v2227_v13 = vmov 0.0   ;;  %s2228_s22 = smov 120  }
  0x3b   : > { %459 = vadd.xlane.f32.xlu0 %v458_v1  ;;  %v2019_v11 = vpack.c.bf16 %v489_v8, %v488_v7  ;;  %1925 = vmatprep.mubr.msk.f32.mxu0 %vm2226_vm1, %v2227_v13  ;;  %v2022_v14 = vpack.c.bf16 %v491_v12, %v490_v9  ;;  %v1842_v19 = vld [vmem:[%s2665_s1] ss:$0 sm:$0xff]  ;;  %s2229_s18 = smov 96   ;;  %s2230_s24 = smov 88   ;;  %vm579_vm2 = vcmask 64512   ;;  %v573_v47 = vld [vmem:[%s2669_s5 + $0x8] sm:$0xff] }
  0x3c   : > { %1933 = vmatprep.subr.mxu1 %v2227_v13  ;;  %1935 = vmatprep.mubr.msk.f32.mxu1 %vm2226_vm1, %v2227_v13  ;;  %v1843_v21 = vld [vmem:[%s2666_s2] ss:$0 sm:$0xff]  ;;  %s2231_s27 = smov 56   ;;  %s2232_s30 = smov 64   ;;  %vm1674_vm3 = vcmask 523264  }
  0x3d   : > { %2020 = vmatpush3.bf16.msra.mxu0 %v2019_v11  ;;  %v1844_v24 = vld [vmem:[%s2668_s4] ss:$0 sm:$0xff]  ;;  %s2233_s25 = smov 80   ;;  %s2234_s14 = smov 112  }
  0x3e   : > { %2021 = vmatprep.subr.bf16.mxu0 %v2225_v10  ;;  %v572_v56 = vld [vmem:[%s2669_s5] sm:$0xff]  ;;  %p2694_p11 = scmp.ne.s32.totalorder %s2689_s20, 0 }
  0x41   : > { %2023 = vmatpush3.bf16.msra.mxu0 %v2022_v14 }
  0x42   : > { %1928 = vmatprep.subr.mxu0 %v2227_v13 }
  0xc8   : > { %v460_v2 = vpop.xlane.xlu0 %459 }
  0xc9   : > { %v462_v3 = vmul.f32 0.03125, %v460_v2 }
  0xcb   : > { %v463_v4 = vsub.f32 %v2425_v0, %v462_v3 }
  0xcd   : > { %v464_v5 = vmul.f32 %v463_v4, %v463_v4 }
  0xcf   : > { %v465_v6 = vsel %vm457_vm0, %v464_v5, 0.0 }
  0xd0   : > { %466 = vadd.xlane.f32.xlu0 %v465_v6 }
 0x15d   : > { %v467_v15 = vpop.xlane.xlu0 %466 }
 0x15e   : > { %v468_v16 = vmul.f32 0.03125, %v467_v15 }
 0x160   : > { %v469_v17 = vadd.f32 1e-05, %v468_v16 }
 0x162   : > { %2102 = vrsqrt.f32 %v469_v17 }
 0x16c   : > { %v2103_v18 = vpop.eup %2102 }
 0x16d   : > { %v471_v20 = vmul.f32 %v2103_v18, %v463_v4 }
 0x16f   : > { %v479_v22 = vmul.f32 %v1842_v19, %v471_v20 }
 0x171   : > { %v487_v23 = vadd.f32 %v1843_v21, %v479_v22  ;;  %v574_v21 = vld [vmem:[%s2669_s5 + $0x10] sm:$0xff] }
 0x173   : > { %1926 = vmatmul.mubr.msk.f32.vlgmr.msra.gmra.mrb[0].mxu0 %vm457_vm0, %v487_v23 }
 0x174   : > { %1930 = vmatprep.mubr.msk.f32.mxu0 %vm2226_vm1, %v2227_v13 }
 0x246   : > { %v568_v25 = vpop.f32.mrb[0].mxu0 }
 0x247   : > { %v2463_v26 = vadd.f32 %v1844_v24, %v568_v25  ;;  %v1927_v27 = vpop.f32.mrb[1].mxu0 }
 0x249   : > { %741 = vrot.lane.b32.xlu0 %v2463_v26, %s2228_s22  ;;  %577 = vrot.lane.b32.xlu1 %v2463_v26, %s2229_s18  ;;  %s2235_s18 = smov 48  }
 0x24d   : > { %743 = vrot.lane.b32.xlu1 %v2463_v26, %s2230_s24  ;;  %s2236_s24 = smov 104  }
 0x2bb   : > { %v578_v28 = vpop.permute.xlu1 %577  ;;  %v742_v30 = vpop.permute.xlu0 %741 }
 0x2bc   : > { %1929 = vmatpush3.xpose.msk.msra.mxu0 %vm579_vm2, %v578_v28 }
 0x2bd   : > { %1938 = vmatprep.subr.mxu0 %v2227_v13 }
 0x2bf   : > { %1931 = vmatmul.mubr.msk.f32.vlgmr.msra.gmra.mrb[2].mxu0 %vm579_vm2, %v2463_v26  ;;  %v744_v29 = vpop.permute.xlu1 %743 }
 0x2c0   : > { %1939 = vmatpush3.xpose.msk.msra.mxu0 %vm579_vm2, %v744_v29  ;;  %1940 = vmatprep.mubr.msk.f32.mxu0 %vm2226_vm1, %v2227_v13 }
 0x2c1   : > { %1948 = vmatprep.subr.mxu0 %v2227_v13 }
 0x2c3   : > { %1941 = vmatmul.mubr.msk.f32.vlgmr.msra.gmra.mrb[4].mxu0 %vm579_vm2, %v742_v30 }
 0x2c4   : > { %1950 = vmatprep.mubr.msk.f32.mxu0 %vm2226_vm1, %v2227_v13  ;;  %1949 = vmatpush3.msra.mxu0 %v573_v47 }
 0x2c5   : > { %1958 = vmatprep.subr.mxu0 %v2227_v13 }
 0x392   : > { %v650_v31 = vpop.f32.mrb[2].mxu0 }
 0x393   : > { %v1932_v32 = vpop.f32.mrb[3].mxu0  ;;  %v654_v33 = vsel %vm579_vm2, %v650_v31, -inf }
 0x394   : > { %655 = vmax.xlane.f32.xlu1 %v654_v33  ;;  %v575_v33 = vld [vmem:[%s2669_s5 + $0x18] sm:$0xff] }
 0x396   : > { %v815_v34 = vpop.f32.mrb[4].mxu0 }
 0x397   : > { %v1942_v35 = vpop.f32.mrb[5].mxu0  ;;  %v819_v36 = vsel %vm579_vm2, %v815_v34, -inf }
 0x398   : > { %820 = vmax.xlane.f32.xlu0 %v819_v36 }
 0x3ae   : > { %830 = vrot.lane.b32.xlu0 %v2463_v26, %s2231_s27  ;;  %s2237_s27 = smov 72  }
 0x421   : > { %v656_v37 = vpop.xlane.xlu1 %655 }
 0x422   : > { %v657_v38 = vsub.f32 %v650_v31, %v656_v37 }
 0x424   : > { %v658_v39 = vmul.f32 1.442695, %v657_v38 }
 0x425   : > { %v821_v40 = vpop.xlane.xlu0 %820 }
 0x426   : > { %2104 = vpow2.f32 %v658_v39  ;;  %v822_v41 = vsub.f32 %v815_v34, %v821_v40 }
 0x428   : > { %v823_v42 = vmul.f32 1.442695, %v822_v41 }
 0x429   : > { %v831_v53 = vpop.permute.xlu0 %830 }
 0x42a   : > { %2106 = vpow2.f32 %v823_v42 }
 0x430   : > { %v2105_v43 = vpop.eup %2104 }
 0x431   : > { %v660_v44 = vsel %vm579_vm2, %v2105_v43, 0.0 }
 0x432   : > { %661 = vadd.xlane.f32.xlu1 %v660_v44 }
 0x434   : > { %v2107_v45 = vpop.eup %2106 }
 0x435   : > { %v825_v46 = vsel %vm579_vm2, %v2107_v45, 0.0 }
 0x436   : > { %826 = vadd.xlane.f32.xlu1 %v825_v46 }
 0x447   : > { %665 = vrot.lane.b32.xlu1 %v2463_v26, %s2232_s30  ;;  %s455_s30 = scalar_lea.vmem [#allocation5], %s1840_s16  ;;  %s2239_s16 = smov [#allocation5]  }
 0x448   : > { %s2160_s22 = sshll.u32 %s2239_s16, 4  ;;  %s2161_s22 = int_to_ptr.vmem [resolvable:$false] %s2160_s22 }
 0x44b   : > { %1054 = vrot.lane.b32.xlu1 %v2463_v26, %s2233_s25  ;;  %s1764_s25 = sshll.u32 %s455_s30, 4  ;;  %s2621_s25 = int_to_ptr.vmem [resolvable:$true] %s1764_s25 }
 0x44c   : > { %s2156_s15 = scalar_lea.vmem %s2621_s25, 128  ;;  %p2163_p7 = scmp.lt.s32.totalorder %s2621_s25, %s2161_s22 }
 0x44d   : > { %p2157_p6 = scmp.ne.s32.totalorder %s2621_s25, %s2156_s15 }
 0x44f   : > { %1052 = vrot.lane.b32.xlu1 %v2463_v26, %s2234_s14  ;;  %s2238_s14 = smov 40   ;;  %p2158_p12 = pnand %p2157_p6, %p2694_p11 }
 0x451   : > { %p2159_p13 = pneg %p2158_p12 }
 0x4bf   : > { %v662_v48 = vpop.xlane.xlu1 %661 }
 0x4c0   : > { %2108 = vrcp.f32 %v662_v48 }
 0x4c3   : > { %v827_v49 = vpop.xlane.xlu1 %826 }
 0x4c4   : > { %2110 = vrcp.f32 %v827_v49 }
 0x4c7   : > { %v666_v50 = vpop.permute.xlu1 %665 }
 0x4c8   : > { %1934 = vmatpush3.msra.mxu1 %v666_v50 }
 0x4c9   : > { %1943 = vmatprep.subr.mxu1 %v2227_v13 }
 0x4ca   : > { %v2109_v51 = vpop.eup %2108 }
 0x4cb   : > { %v664_v52 = vmul.f32 %v2109_v51, %v2105_v43  ;;  %v1055_v59 = vpop.permute.xlu1 %1054 }
 0x4cd   : > { %1936 = vmatmul.mubr.msk.f32.vlgmr.msra.gmra.mrb[0].mxu1 %vm579_vm2, %v664_v52 }
 0x4ce   : > { %v2111_v54 = vpop.eup %2110  ;;  %1944 = vmatpush3.msra.mxu1 %v831_v53  ;;  %1945 = vmatprep.mubr.msk.f32.mxu1 %vm2226_vm1, %v2227_v13  ;;  %v1568_v53 = vld [vmem:[%s2673_s9] sm:$0xff] }
 0x4cf   : > { %v829_v55 = vmul.f32 %v2111_v54, %v2107_v45  ;;  %1953 = vmatprep.subr.mxu1 %v2227_v13  ;;  %v1053_v62 = vpop.permute.xlu1 %1052  ;;  %v1862_v45 = vld [vmem:[%s2670_s6] ss:$0 sm:$0xff] }
 0x4d1   : > { %1946 = vmatmul.mubr.msk.f32.vlgmr.msra.gmra.mrb[2].mxu1 %vm579_vm2, %v829_v55  ;;  %v1570_v55 = vld [vmem:[%s2673_s9 + $0x10] sm:$0xff] }
 0x4d2   : > { %1955 = vmatprep.mubr.msk.f32.mxu1 %vm2226_vm1, %v2227_v13  ;;  %1954 = vmatpush3.msra.mxu1 %v572_v56  ;;  %v1571_v56 = vld [vmem:[%s2673_s9 + $0x18] sm:$0xff] }
 0x4d3   : > { %1963 = vmatprep.subr.mxu1 %v2227_v13 }
 0x5a0   : > { %v737_v57 = vpop.f32.mrb[0].mxu1 }
 0x5a1   : > { %v1937_v58 = vpop.f32.mrb[1].mxu1  ;;  %1956 = vmatmul.mubr.msk.f32.vlgmr.msra.gmra.mrb[4].mxu1 %vm579_vm2, %v737_v57  ;;  %v2028_v57 = vpack.c.bf16 %v1571_v56, %v1570_v55 }
 0x5a2   : > { %1965 = vmatprep.mubr.msk.f32.mxu1 %vm2226_vm1, %v2227_v13 }
 0x5a4   : > { %v902_v60 = vpop.f32.mrb[2].mxu1 }
 0x5a5   : > { %v1947_v61 = vpop.f32.mrb[3].mxu1  ;;  %1951 = vmatmul.mubr.msk.f32.vlgmr.msra.gmra.mrb[6].mxu0 %vm579_vm2, %v902_v60 }
 0x5a6   : > { %1959 = vmatpush3.xpose.msk.msra.mxu0 %vm579_vm2, %v1055_v59  ;;  %1960 = vmatprep.mubr.msk.f32.mxu0 %vm2226_vm1, %v2227_v13 }
 0x5a7   : > { %1968 = vmatprep.subr.mxu0 %v2227_v13 }
 0x5a9   : > { %1961 = vmatmul.mubr.msk.f32.vlgmr.msra.gmra.mrb[8].mxu0 %vm579_vm2, %v1053_v62  ;;  %v1863_v62 = vld [vmem:[%s2671_s7] ss:$0 sm:$0xff] }
 0x5aa   : > { %1970 = vmatprep.mubr.msk.f32.mxu0 %vm2226_vm1, %v2227_v13  ;;  %1969 = vmatpush3.msra.mxu0 %v574_v21 }
 0x5ab   : > { %1978 = vmatprep.subr.mxu0 %v2227_v13 }
 0x674   : > { %v1048_v63 = vpop.f32.mrb[4].mxu1 }
 0x675   : > { %v1957_v1 = vpop.f32.mrb[5].mxu1 }
 0x676   : > { %v1864_v1 = vld [vmem:[%s2672_s8] ss:$0 sm:$0xff] }
 0x678   : > { %v975_v2 = vpop.f32.mrb[6].mxu0 }
 0x679   : > { %v1049_v3 = vadd.f32 %v1048_v63, %v975_v2  ;;  %v1952_v4 = vpop.f32.mrb[7].mxu0 }
 0x67a   : > { %v1659_v4 = vld [vmem:[%s2675_s11] sm:$0xff] }
 0x67c   : > { %v1126_v5 = vpop.f32.mrb[8].mxu0 }
 0x67d   : > { %v1962_v6 = vpop.f32.mrb[9].mxu0  ;;  %v1130_v7 = vsel %vm579_vm2, %v1126_v5, -inf }
 0x67e   : > { %1131 = vmax.xlane.f32.xlu1 %v1130_v7  ;;  %v1661_v7 = vld [vmem:[%s2675_s11 + $0x10] sm:$0xff] }
 0x68f   : > { %1141 = vrot.lane.b32.xlu1 %v2463_v26, %s2235_s18  ;;  %s2162_s18 = scalar_lea.vmem %s2161_s22, 256 }
 0x690   : > { %p2164_p10 = scmp.lt.s32.totalorder %s2162_s18, %s2156_s15 }
 0x692   : > { %p2165_p2 = por %p2164_p10, %p2163_p7 }
 0x693   : > { %1291 = vrot.lane.b32.xlu1 %v2463_v26, %s2236_s24 }
 0x694   : > { %p2166_p4 = pnand %p2165_p2, %p2159_p13 }
 0x70b   : > { %v1132_v8 = vpop.xlane.xlu1 %1131 }
 0x70c   : > { %v1133_v9 = vsub.f32 %v1126_v5, %v1132_v8  ;;  %v1660_v5 = vld [vmem:[%s2675_s11 + $0x8] sm:$0xff]  ;;  %v1662_v8 = vld [vmem:[%s2675_s11 + $0x18] sm:$0xff] }
 0x70d   : > { %v2031_v6 = vpack.c.bf16 %v1660_v5, %v1659_v4 }
 0x70e   : > { %v1134_v11 = vmul.f32 1.442695, %v1133_v9  ;;  %v2034_v9 = vpack.c.bf16 %v1662_v8, %v1661_v7 }
 0x70f   : > { %v1142_v12 = vpop.permute.xlu1 %1141 }
 0x710   : > { %2112 = vpow2.f32 %v1134_v11  ;;  %1964 = vmatpush3.msra.mxu1 %v1142_v12  ;;  %v1663_v11 = vld [vmem:[%s2675_s11 + $0x20] sm:$0xff]  ;;  %v1664_v12 = vld [vmem:[%s2675_s11 + $0x28] sm:$0xff] }
 0x711   : > { %1973 = vmatprep.subr.mxu1 %v2227_v13 }
 0x713   : > { %v1292_v20 = vpop.permute.xlu1 %1291 }
 0x71a   : > { %v2113_v14 = vpop.eup %2112 }
 0x71b   : > { %v1136_v15 = vsel %vm579_vm2, %v2113_v14, 0.0 }
 0x71c   : > { %1137 = vadd.xlane.f32.xlu0 %v1136_v15  ;;  %v1665_v15 = vld [vmem:[%s2675_s11 + $0x30] sm:$0xff] }
 0x732   : > { %1293 = vrot.lane.b32.xlu0 %v2463_v26, %s2237_s27  ;;  %s1871_s27 = sshll.u32 %s2331_s29, 7  ;;  %s1751_s29 = scalar_lea.sflag [#allocation4], %s2415_s23 }
 0x733   : > { %s2619_s19 = scalar_lea.hbm %s2677_s13, %s1871_s27 }
 0x7a9   : > { %v1138_v16 = vpop.xlane.xlu0 %1137 }
 0x7aa   : > { %2114 = vrcp.f32 %v1138_v16  ;;  %v1666_v16 = vld [vmem:[%s2675_s11 + $0x38] sm:$0xff] }
 0x7ad   : > { %v1294_v19 = vpop.permute.xlu0 %1293 }
 0x7b4   : > { %v2115_v17 = vpop.eup %2114 }
 0x7b5   : > { %v1140_v18 = vmul.f32 %v2115_v17, %v2113_v14  ;;  %v2037_v14 = vpack.c.bf16 %v1664_v12, %v1663_v11  ;;  %v2040_v17 = vpack.c.bf16 %v1666_v16, %v1665_v15 }
 0x7b7   : > { %1966 = vmatmul.mubr.msk.f32.vlgmr.msra.gmra.mrb[6].mxu1 %vm579_vm2, %v1140_v18  ;;  %v1865_v18 = vld [vmem:[%s2674_s10] ss:$0 sm:$0xff] }
 0x7b8   : > { %1974 = vmatpush3.xpose.msk.msra.mxu1 %vm579_vm2, %v1294_v19  ;;  %1975 = vmatprep.mubr.msk.f32.mxu1 %vm2226_vm1, %v2227_v13 }
 0x7b9   : > { %1983 = vmatprep.subr.mxu1 %v2227_v13 }
 0x7bb   : > { %1976 = vmatmul.mubr.msk.f32.vlgmr.msra.gmra.mrb[8].mxu1 %vm579_vm2, %v1292_v20 }
 0x7bc   : > { %1985 = vmatprep.mubr.msk.f32.mxu1 %vm2226_vm1, %v2227_v13  ;;  %1984 = vmatpush3.msra.mxu1 %v575_v33 }
 0x7bd   : > { %2030 = vmatprep.subr.bf16.mxu1 %v2225_v10 }
 0x88a   : > { %v1213_v22 = vpop.f32.mrb[6].mxu1 }
 0x88b   : > { %v1967_v23 = vpop.f32.mrb[7].mxu1  ;;  %1971 = vmatmul.mubr.msk.f32.vlgmr.msra.gmra.mrb[10].mxu0 %vm579_vm2, %v1213_v22 }
 0x88c   : > { %1980 = vmatprep.mubr.msk.f32.mxu0 %vm2226_vm1, %v2227_v13 }
 0x88e   : > { %v1365_v24 = vpop.f32.mrb[8].mxu1 }
 0x88f   : > { %v1977_v25 = vpop.f32.mrb[9].mxu1  ;;  %v1369_v27 = vsel %vm579_vm2, %v1365_v24, -inf }
 0x890   : > { %1370 = vmax.xlane.f32.xlu1 %v1369_v27  ;;  %v1868_v27 = vld [vmem:[%s2676_s12] ss:$0 sm:$0xff] }
 0x91d   : > { %v1371_v28 = vpop.xlane.xlu1 %1370 }
 0x91e   : > { %v1372_v29 = vsub.f32 %v1365_v24, %v1371_v28 }
 0x920   : > { %v1373_v30 = vmul.f32 1.442695, %v1372_v29 }
 0x922   : > { %2116 = vpow2.f32 %v1373_v30 }
 0x92c   : > { %v2117_v31 = vpop.eup %2116 }
 0x92d   : > { %v1375_v32 = vsel %vm579_vm2, %v2117_v31, 0.0 }
 0x92e   : > { %1376 = vadd.xlane.f32.xlu0 %v1375_v32 }
 0x944   : > { %1380 = vrot.lane.b32.xlu0 %v2463_v26, %s2238_s14 }
 0x95e   : > { %v1286_v34 = vpop.f32.mrb[10].mxu0 }
 0x95f   : > { %v1290_v35 = vadd.f32 %v1286_v34, %v1049_v3  ;;  %v1972_v36 = vpop.f32.mrb[11].mxu0 }
 0x9bb   : > { %v1377_v37 = vpop.xlane.xlu0 %1376 }
 0x9bc   : > { %2118 = vrcp.f32 %v1377_v37 }
 0x9bf   : > { %v1381_v38 = vpop.permute.xlu0 %1380 }
 0x9c0   : > { %1979 = vmatpush3.msra.mxu0 %v1381_v38 }
 0x9c1   : > { %2024 = vmatprep.subr.bf16.mxu0 %v2225_v10 }
 0x9c6   : > { %v2119_v39 = vpop.eup %2118 }
 0x9c7   : > { %v1379_v40 = vmul.f32 %v2119_v39, %v2117_v31 }
 0x9c9   : > { %1981 = vmatmul.mubr.msk.f32.vlgmr.msra.gmra.mrb[12].mxu0 %vm579_vm2, %v1379_v40 }
 0x9ca   : > { %1996 = vmatprep.mubr.msk.f32.mxu0 %vm2226_vm1, %v2227_v13 }
 0xa9c   : > { %v1452_v26 = vpop.f32.mrb[12].mxu0 }
 0xa9d   : > { %v1982_v41 = vpop.f32.mrb[13].mxu0  ;;  %1986 = vmatmul.mubr.msk.f32.vlgmr.msra.gmra.mrb[10].mxu1 %vm579_vm2, %v1452_v26 }
 0xa9e   : > { %2015 = vmatprep.mubr.msk.f32.mxu1 %vm2226_vm1, %v2227_v13  ;;  %2032 = vmatpush3.bf16.msra.mxu1 %v2031_v6 }
 0xa9f   : > { %2033 = vmatprep.subr.bf16.mxu1 %v2225_v10 }
 0xaa2   : > { %2035 = vmatpush3.bf16.msra.mxu1 %v2034_v9 }
 0xaa3   : > { %2036 = vmatprep.subr.bf16.mxu1 %v2225_v10 }
 0xaa6   : > { %2038 = vmatpush3.bf16.msra.mxu1 %v2037_v14 }
 0xaa7   : > { %2039 = vmatprep.subr.bf16.mxu1 %v2225_v10 }
 0xaaa   : > { %2041 = vmatpush3.bf16.msra.mxu1 %v2040_v17 }
 0xb70   : > { %v1525_v42 = vpop.f32.mrb[10].mxu1 }
 0xb71   : > { %v1529_v43 = vadd.f32 %v1525_v42, %v1290_v35  ;;  %v1987_v44 = vpop.f32.mrb[11].mxu1 }
 0xb73   : > { %v1530_v46 = vadd.f32 %v1529_v43, %v2425_v0  ;;  %v1569_v0 = vld [vmem:[%s2673_s9 + $0x8] sm:$0xff] }
 0xb74   : > { %v2025_v54 = vpack.c.bf16 %v1569_v0, %v1568_v53 }
 0xb75   : > { %v2553_v47 = vadd.f32 %v1862_v45, %v1530_v46 }
 0xb76   : > { %2026 = vmatpush3.bf16.msra.mxu0 %v2025_v54 }
 0xb77   : > { %v1539_v48 = vsel %vm457_vm0, %v2553_v47, 0.0  ;;  %2027 = vmatprep.subr.bf16.mxu0 %v2225_v10 }
 0xb78   : > { %1540 = vadd.xlane.f32.xlu1 %v1539_v48 }
 0xb7a   : > { %2029 = vmatpush3.bf16.msra.mxu0 %v2028_v57 }
 0xc05   : > { %v1541_v49 = vpop.xlane.xlu1 %1540 }
 0xc06   : > { %v1542_v50 = vmul.f32 0.03125, %v1541_v49 }
 0xc08   : > { %v1543_v51 = vsub.f32 %v2553_v47, %v1542_v50 }
 0xc0a   : > { %v1544_v13 = vmul.f32 %v1543_v51, %v1543_v51 }
 0xc0c   : > { %v1545_v52 = vsel %vm457_vm0, %v1544_v13, 0.0 }
 0xc0d   : > { %1546 = vadd.xlane.f32.xlu1 %v1545_v52 }
 0xc9a   : > { %v1547_v58 = vpop.xlane.xlu1 %1546 }
 0xc9b   : > { %v1548_v59 = vmul.f32 0.03125, %v1547_v58 }
 0xc9d   : > { %v1549_v60 = vadd.f32 1e-05, %v1548_v59 }
 0xc9f   : > { %2120 = vrsqrt.f32 %v1549_v60 }
 0xca9   : > { %v2121_v61 = vpop.eup %2120 }
 0xcaa   : > { %v1551_v63 = vmul.f32 %v2121_v61, %v1543_v51 }
 0xcac   : > { %v1559_v2 = vmul.f32 %v1863_v62, %v1551_v63 }
 0xcae   : > { %v1567_v3 = vadd.f32 %v1864_v1, %v1559_v2 }
 0xcb0   : > { %1997 = vmatmul.mubr.msk.f32.vlgmr.msra.gmra.mrb[14].mxu0 %vm457_vm0, %v1567_v3 }
 0xd83   : > { %v1648_v19 = vpop.f32.mrb[14].mxu0 }
 0xd84   : > { %v1649_v20 = vadd.f32 %v1865_v18, %v1648_v19  ;;  %v1998_v21 = vpop.f32.mrb[15].mxu0 }
 0xd86   : > { %v1867_v10 = vmul.f32 -1.442695, %v1649_v20 }
 0xd88   : > { %2122 = vpow2.f32 %v1867_v10 }
 0xd92   : > { %v2123_v22 = vpop.eup %2122 }
 0xd93   : > { %v1655_v23 = vadd.f32 1.0, %v2123_v22 }
 0xd95   : > { %2124 = vrcp.f32 %v1655_v23 }
 0xd9f   : > { %v2125_v24 = vpop.eup %2124 }
 0xda0   : > { %v1658_v25 = vmul.f32 %v2125_v24, %v1649_v20 }
 0xda2   : > { %2016 = vmatmul.mubr.msk.f32.vlgmr.msra.gmra.mrb[12].mxu1 %vm1674_vm3, %v1658_v25 }
 0xe75   : > { %v1744_v28 = vpop.f32.mrb[12].mxu1 }
 0xe76   : > { %v1745_v29 = vadd.f32 %v1868_v27, %v1744_v28  ;;  %v2017_v30 = vpop.f32.mrb[13].mxu1 }
 0xe78   : > { %v1748_v31 = vadd.f32 %v1745_v29, %v2553_v47 }
 0xe7a   : > { %1749 = vst.msk [vmem:[%s455_s30] sm:$0xff] %vm457_vm0, %v1748_v31 }
 0xe7b   : > { %2169 = shalt.err (!%p2166_p4)
}
 0xe7c   : > { %s2170_s23 = scalar_lea.hbm %s2619_s19, 128  ;;  %s2174_s30 = scalar_lea.hbm %s2677_s13, 256 }
 0xe7d   : > { %p2171_p5 = scmp.ne.s32.totalorder %s2619_s19, %s2170_s23  ;;  %p2175_p0 = scmp.lt.u32.totalorder %s2619_s19, %s2677_s13 }
 0xe7e   : > { %p2176_p1 = scmp.lt.u32.totalorder %s2174_s30, %s2170_s23  ;;  %p2178_p6 = scmp.lt.u32.totalorder %s2170_s23, %s2619_s19 }
 0xe7f   : > { %p2172_p8 = pnand %p2171_p5, %p2694_p11 }
 0xe80   : > { %p2177_p3 = por %p2176_p1, %p2175_p0 }
 0xe81   : > { %p2173_p9 = pneg %p2172_p8 }
 0xe82   : > { %p2179_p12 = por %p2178_p6, %p2177_p3 }
 0xe84   : > { %p2180_p13 = pnand %p2179_p12, %p2173_p9 }
 0xe86   : > { %2183 = shalt.err (!%p2180_p13)
}
 0xe87   : > { %2044 = dma.vmem_to_hbm [thread:$0]  (%p2694_p11), %s2621_s25, 128, %s2619_s19, %s1751_s29  }
 0xe88 PF: > { %s2695_s15 = sld [smem:[#allocation8_spill]]  ;;  %p2696_p7 = scmp.ne.s32.totalorder %s2690_s21, 0 }
 0xe89   : > { %p2697_p10 = scmp.ge.s32.totalorder %s2222_s28, 2 }
 0xe8b   : > { %p2051_p2 = pnand %p2697_p10, %p2696_p7 }
 0xe8e   : > { %s1776_s16 = sand.u32 1, %s2695_s15  }
 0xe8f   : > { %s1777_s22 = scalar_lea.sflag [#allocation4], %s1776_s16 }
 0xe90   : > { %2205 = dma.done.wait (!%p2051_p2), %s1777_s22, 128  }
 0xe91   : > { %2207 = vsyncadd (!%p2051_p2), %s1777_s22, 4294967168  ;;  %s2698_s28 = sld [smem:[#allocation10_spill]]  ;;  %s2699_s18 = sld [smem:[#allocation9_spill]] }
 0xe92   : > { %s2700_s27 = sld [smem:[#allocation11_spill]]  ;;  %s2701_s25 = smov %s2214_s26 }
 0xe97   : > { %p26_p4 = scmp.ge.s32.totalorder %s2698_s28, 4   ;;  %s2702_s26 = smov %s2699_s18 }
 0xe99   :  { %28 = sbr.rel (!%p26_p4) target bundleno = 5 (0x5), region = 117 }
 0xea0   :  { %1782 = vsyncpa [#allocation3], 1 }
 0xea1   :  { %1784 = vsyncpa [#allocation3 + $0x1], 1 }
 0xea2   :  { %1785 = vsyncpa [#allocation4], 1 }
 0xea3   :  { %1787 = vsyncpa [#allocation4 + $0x1], 1 }

</bundles_post_ra>
